<compile_context>
chip_gen: v6e
topology: v6e:2x2x1
jax: 0.10.0
libtpu: 0.0.40
codegen_flags: <defaults>
</compile_context>

<pallas_src>
import functools

import jax
import jax.numpy as jnp
from jax import lax
from jax.experimental import pallas as pl
from jax.experimental.pallas import tpu as pltpu


def _round_up(x, m):
    return ((x + m - 1) // m) * m


def _self_attention_kernel(x_ref, wqkv_ref, bqkv_ref, gamma_ref, o_ref, qkv_ref,
                           *, cq_pad, c, tq, n_real, n_pad):
    """Grid = (batch, query_tile). x_ref: (1, C, Npad); o_ref: (1, C, Tq)."""
    qi = pl.program_id(1)

    # Fused QKV projection, once per batch (query-tile 0), stored bf16 in VMEM
    # scratch that persists across the query-tile grid axis.
    @pl.when(qi == 0)
    def _():
        x_bf16 = x_ref[0].astype(jnp.bfloat16)                      # (C, Npad)
        qkv = jnp.dot(wqkv_ref[...], x_bf16,
                      preferred_element_type=jnp.float32)           # (CQKVp, Npad)
        qkv = qkv + bqkv_ref[...]                                   # bias (f32)
        qkv_ref[...] = qkv.astype(jnp.bfloat16)

    q_start = pl.multiple_of(qi * tq, tq)

    # Sections are 16-row aligned (bf16 sublane tile), so these are clean slices.
    q_t = qkv_ref[0:cq_pad, pl.ds(q_start, tq)]                     # (Cqp, Tq)
    k = qkv_ref[cq_pad:2 * cq_pad, :]                               # (Cqp, Npad)
    v = qkv_ref[2 * cq_pad:2 * cq_pad + c, :]                       # (C,  Npad)
    # Padded q/k rows are exactly zero (zero weight rows + zero bias), so they
    # contribute nothing to the channel contraction below.

    # energy[i, j] = sum_c q[c, i] * k[c, j]   (contract dim 0 of both; no .T)
    energy = lax.dot_general(q_t, k, (((0,), (0,)), ((), ())),
                             preferred_element_type=jnp.float32)    # (Tq, Npad)

    if n_pad != n_real:  # static: mask padded key columns out of the softmax
        col = lax.broadcasted_iota(jnp.int32, (tq, n_pad), 1)
        energy = jnp.where(col < n_real, energy, -1e30)

    # softmax over keys (f32 math, max-stabilized)
    energy = energy - jnp.max(energy, axis=-1, keepdims=True)
    e = jnp.exp(energy)
    attn = e * pl.reciprocal(jnp.sum(e, axis=-1, keepdims=True), approx=True)

    # out[c, i] = sum_j v[c, j] * attn[i, j]   (contract dim 1 of both; no .T)
    out = lax.dot_general(v, attn.astype(jnp.bfloat16),
                          (((1,), (1,)), ((), ())),
                          preferred_element_type=jnp.float32)       # (C, Tq)

    x_tile = x_ref[0, :, pl.ds(q_start, tq)]                        # (C, Tq) f32
    o_ref[0] = (gamma_ref[0] * out + x_tile).astype(o_ref.dtype)


def self_attention_pallas(x, wq, bq, wk, bk, wv, bv, gamma, *, tq=128):
    """x: (B, C, W, H) f32; wq/wk: (Cq, C); wv: (C, C); biases (*, 1); gamma (1,)."""
    B, C, W, H = x.shape
    N = W * H
    Cq = wq.shape[0]
    Cq_pad = _round_up(Cq, 16)          # bf16 sublane-tile aligned sections
    CQKVp = 2 * Cq_pad + C
    Npad = _round_up(N, 128)
    tq = min(tq, Npad)
    num_q_tiles = Npad // tq

    x_flat = x.reshape(B, C, N)
    if Npad != N:
        x_flat = jnp.pad(x_flat, ((0, 0), (0, 0), (0, Npad - N)))

    # Fuse (and sublane-pad) the three 1x1-conv weights/biases into one projection.
    w_qkv = jnp.zeros((CQKVp, C), jnp.float32)
    w_qkv = w_qkv.at[:Cq].set(wq)
    w_qkv = w_qkv.at[Cq_pad:Cq_pad + Cq].set(wk)
    w_qkv = w_qkv.at[2 * Cq_pad:2 * Cq_pad + C].set(wv)
    w_qkv = w_qkv.astype(jnp.bfloat16)          # MXU operand; halves weight DMA
    b_qkv = jnp.zeros((CQKVp, 1), jnp.float32)
    b_qkv = b_qkv.at[:Cq].set(bq)
    b_qkv = b_qkv.at[Cq_pad:Cq_pad + Cq].set(bk)
    b_qkv = b_qkv.at[2 * Cq_pad:2 * Cq_pad + C].set(bv)

    kernel = functools.partial(_self_attention_kernel, cq_pad=Cq_pad, c=C,
                               tq=tq, n_real=N, n_pad=Npad)

    out_flat = pl.pallas_call(
        kernel,
        out_shape=jax.ShapeDtypeStruct((B, C, Npad), x.dtype),
        grid=(B, num_q_tiles),
        in_specs=[
            pl.BlockSpec((1, C, Npad), lambda b, qi: (b, 0, 0)),    # x slab / batch
            pl.BlockSpec((CQKVp, C), lambda b, qi: (0, 0)),         # fused W_qkv
            pl.BlockSpec((CQKVp, 1), lambda b, qi: (0, 0)),         # fused b_qkv
            pl.BlockSpec(memory_space=pltpu.MemorySpace.SMEM),      # gamma scalar
        ],
        out_specs=pl.BlockSpec((1, C, tq), lambda b, qi: (b, 0, qi)),
        scratch_shapes=[pltpu.VMEM((CQKVp, Npad), jnp.bfloat16)],   # fused q/k/v
        compiler_params=pltpu.CompilerParams(
            dimension_semantics=("parallel", "arbitrary")),
    )(x_flat, w_qkv, b_qkv, gamma)

    return out_flat[:, :, :N].reshape(B, C, W, H)


def self_attention_ref(x, wq, bq, wk, bk, wv, bv, gamma):
    """Plain-JAX f32 reference mirroring the PyTorch forward exactly."""
    B, C, W, H = x.shape
    N = W * H
    xf = x.reshape(B, C, N)
    q = jnp.einsum('oc,bcn->bon', wq, xf) + bq[None]        # (B, Cq, N)
    k = jnp.einsum('oc,bcn->bon', wk, xf) + bk[None]        # (B, Cq, N)
    v = jnp.einsum('oc,bcn->bon', wv, xf) + bv[None]        # (B, C , N)
    energy = jnp.einsum('bci,bcj->bij', q, k)               # (B, N, N)
    attn = jax.nn.softmax(energy, axis=-1)
    out = jnp.einsum('bcj,bij->bci', v, attn).reshape(B, C, W, H)
    return gamma[0] * out + x


def _make_case(key, B, C, W, H):
    Cq = C // 8
    ks = jax.random.split(key, 7)
    x = jax.random.normal(ks[0], (B, C, W, H), dtype=jnp.float32)
    wq = jax.random.normal(ks[1], (Cq, C), dtype=jnp.float32) * 0.1
    bq = jax.random.normal(ks[2], (Cq, 1), dtype=jnp.float32) * 0.1
    wk = jax.random.normal(ks[3], (Cq, C), dtype=jnp.float32) * 0.1
    bk = jax.random.normal(ks[4], (Cq, 1), dtype=jnp.float32) * 0.1
    wv = jax.random.normal(ks[5], (C, C), dtype=jnp.float32) * 0.1
    bv = jax.random.normal(ks[6], (C, 1), dtype=jnp.float32) * 0.1
    # PyTorch inits gamma to 0 (output == x); use nonzero so attention is checked.
    gamma = jnp.full((1,), 0.5, dtype=jnp.float32)
    return x, wq, bq, wk, bk, wv, bv, gamma


if __name__ == "__main__":
    key = jax.random.PRNGKey(0)
    k1, k2 = jax.random.split(key)

    # Case 1: N=64 (< 128) exercises the lane-padding + key-mask path.
    # Case 2: N=256 exercises multiple query tiles reusing the QKV scratch.
    cases = [_make_case(k1, 2, 16, 8, 8), _make_case(k2, 1, 32, 16, 16)]

    for args in cases:
        out = self_attention_pallas(*args)
        out = jax.block_until_ready(out)
        ref = self_attention_ref(*args)
        assert out.shape == args[0].shape
        # bf16 MXU operands (f32 accumulation) -> bf16-level tolerance.
        assert jnp.allclose(out, ref, atol=2e-2, rtol=2e-2), "mismatch vs reference"

    print("KERNEL_OK")
</pallas_src>

<mosaic_0001>
module attributes {stable_mosaic.version = 11 : i64} {
  func.func @_self_attention_kernel(%arg0: i32, %arg1: i32, %arg2: memref<1x16x128xf32, #tpu.memory_space<vmem>>, %arg3: memref<48x16xbf16, #tpu.memory_space<vmem>>, %arg4: memref<48x1xf32, #tpu.memory_space<vmem>>, %arg5: memref<1xf32, #tpu.memory_space<smem>>, %arg6: memref<1x16x128xf32, #tpu.memory_space<vmem>>, %arg7: memref<48x128xbf16, #tpu.memory_space<vmem>>) attributes {dimension_semantics = [#tpu.dimension_semantics<parallel>, #tpu.dimension_semantics<arbitrary>], iteration_bounds = array<i64: 2, 1>, scalar_prefetch = 0 : i64, scratch_operands = 1 : i64, tpu.core_type = #tpu.core_type<tc>, window_params = [{transform_indices = @transform_0, window_bounds = array<i64: 1, 16, 128>}, {pipeline_mode = #tpu.pipeline_mode<synchronous>, transform_indices = @transform_1, window_bounds = array<i64: 48, 16>}, {pipeline_mode = #tpu.pipeline_mode<synchronous>, transform_indices = @transform_2, window_bounds = array<i64: 48, 1>}, {transform_indices = @transform_3, window_bounds = array<i64: 1>}, {transform_indices = @transform_4, window_bounds = array<i64: 1, 16, 128>}]} {
    %c0_i32 = arith.constant 0 : i32
    %0 = arith.cmpi eq, %arg1, %c0_i32 : i32
    %1 = arith.extui %0 : i1 to i32
    %c0_i32_0 = arith.constant 0 : i32
    %2 = arith.cmpi ne, %1, %c0_i32_0 : i32
    scf.if %2 {
      %c0_13 = arith.constant 0 : index
      %c0_14 = arith.constant 0 : index
      %c0_15 = arith.constant 0 : index
      %37 = vector.load %arg2[%c0_13, %c0_14, %c0_15] : memref<1x16x128xf32, #tpu.memory_space<vmem>>, vector<1x16x128xf32>
      %38 = vector.shape_cast %37 : vector<1x16x128xf32> to vector<16x128xf32>
      %39 = arith.truncf %38 : vector<16x128xf32> to vector<16x128xbf16>
      %c0_16 = arith.constant 0 : index
      %c0_17 = arith.constant 0 : index
      %40 = vector.load %arg3[%c0_16, %c0_17] : memref<48x16xbf16, #tpu.memory_space<vmem>>, vector<48x16xbf16>
      %cst_18 = arith.constant dense<0.000000e+00> : vector<48x128xf32>
      %41 = tpu.matmul %40, %39, %cst_18 {dimension_numbers = #tpu.dot_dimension_numbers<[1], [0], [0], [1], [0, 0, 1, 1], [], []>} : vector<48x16xbf16>, vector<16x128xbf16>, vector<48x128xf32> -> vector<48x128xf32>
      %c0_19 = arith.constant 0 : index
      %c0_20 = arith.constant 0 : index
      %42 = vector.load %arg4[%c0_19, %c0_20] : memref<48x1xf32, #tpu.memory_space<vmem>>, vector<48x1xf32>
      %43 = vector.broadcast %42 : vector<48x1xf32> to vector<48x128xf32>
      %44 = arith.addf %41, %43 : vector<48x128xf32>
      %45 = arith.truncf %44 : vector<48x128xf32> to vector<48x128xbf16>
      %c0_21 = arith.constant 0 : index
      %c0_22 = arith.constant 0 : index
      %46 = vector.load %arg7[%c0_21, %c0_22] : memref<48x128xbf16, #tpu.memory_space<vmem>>, vector<48x128xbf16>
      tpu.vector_store %arg7[%c0_21, %c0_22], %45 {strides = array<i32>} : memref<48x128xbf16, #tpu.memory_space<vmem>>, vector<48x128xbf16>,
    } else {
    }
    %c128_i32 = arith.constant 128 : i32
    %3 = arith.muli %arg1, %c128_i32 : i32
    %4 = tpu.assume_multiple %3, 128 : i32
    %c0 = arith.constant 0 : index
    %5 = arith.index_cast %4 : i32 to index
    %6 = vector.load %arg7[%c0, %5] : memref<48x128xbf16, #tpu.memory_space<vmem>>, vector<16x128xbf16>
    %c16 = arith.constant 16 : index
    %c0_1 = arith.constant 0 : index
    %7 = vector.load %arg7[%c16, %c0_1] : memref<48x128xbf16, #tpu.memory_space<vmem>>, vector<16x128xbf16>
    %c32 = arith.constant 32 : index
    %c0_2 = arith.constant 0 : index
    %8 = vector.load %arg7[%c32, %c0_2] : memref<48x128xbf16, #tpu.memory_space<vmem>>, vector<16x128xbf16>
    %cst = arith.constant dense<0.000000e+00> : vector<128x128xf32>
    %9 = tpu.matmul %6, %7, %cst {dimension_numbers = #tpu.dot_dimension_numbers<[0], [0], [1], [1], [0, 1, 1, 1], [], []>} : vector<16x128xbf16>, vector<16x128xbf16>, vector<128x128xf32> -> vector<128x128xf32>
    %10 = tpu.iota {dimensions = array<i32: 1>} : vector<128x128xi32>
    %c64_i32 = arith.constant 64 : i32
    %11 = vector.broadcast %c64_i32 : i32 to vector<128x128xi32>
    %12 = arith.cmpi slt, %10, %11 : vector<128x128xi32>
    %cst_3 = arith.constant -1.000000e+30 : f32
    %13 = vector.broadcast %cst_3 : f32 to vector<128x128xf32>
    %14 = arith.select %12, %9, %13 : vector<128x128xi1>, vector<128x128xf32>
    %cst_4 = arith.constant dense<0xFF800000> : vector<128xf32>
    %15 = vector.multi_reduction <maximumf>, %14, %cst_4 [1] : vector<128x128xf32> to vector<128xf32>
    %16 = vector.shape_cast %15 : vector<128xf32> to vector<128x1xf32>
    %17 = vector.broadcast %16 : vector<128x1xf32> to vector<128x128xf32>
    %18 = arith.subf %14, %17 : vector<128x128xf32>
    %19 = math.exp %18 : vector<128x128xf32>
    %cst_5 = arith.constant dense<0.000000e+00> : vector<128xf32>
    %20 = vector.multi_reduction <add>, %19, %cst_5 [1] : vector<128x128xf32> to vector<128xf32>
    %21 = vector.shape_cast %20 : vector<128xf32> to vector<128x1xf32>
    %22 = tpu.reciprocal %21 {approx = true} : vector<128x1xf32> -> vector<128x1xf32>
    %23 = vector.broadcast %22 : vector<128x1xf32> to vector<128x128xf32>
    %24 = arith.mulf %19, %23 : vector<128x128xf32>
    %25 = arith.truncf %24 : vector<128x128xf32> to vector<128x128xbf16>
    %cst_6 = arith.constant dense<0.000000e+00> : vector<16x128xf32>
    %26 = tpu.matmul %8, %25, %cst_6 {dimension_numbers = #tpu.dot_dimension_numbers<[1], [1], [0], [0], [0, 0, 1, 0], [], []>} : vector<16x128xbf16>, vector<128x128xbf16>, vector<16x128xf32> -> vector<16x128xf32>
    %c0_7 = arith.constant 0 : index
    %c0_8 = arith.constant 0 : index
    %27 = arith.index_cast %4 : i32 to index
    %28 = vector.load %arg2[%c0_7, %c0_8, %27] : memref<1x16x128xf32, #tpu.memory_space<vmem>>, vector<1x16x128xf32>
    %29 = vector.shape_cast %28 : vector<1x16x128xf32> to vector<16x128xf32>
    %c0_9 = arith.constant 0 : index
    %30 = memref.load %arg5[%c0_9] : memref<1xf32, #tpu.memory_space<smem>>
    %31 = vector.broadcast %30 : f32 to vector<16x128xf32>
    %32 = arith.mulf %31, %26 : vector<16x128xf32>
    %33 = arith.addf %32, %29 : vector<16x128xf32>
    %c0_10 = arith.constant 0 : index
    %c0_11 = arith.constant 0 : index
    %c0_12 = arith.constant 0 : index
    %34 = vector.load %arg6[%c0_10, %c0_11, %c0_12] : memref<1x16x128xf32, #tpu.memory_space<vmem>>, vector<1x16x128xf32>
    %35 = vector.shape_cast %34 : vector<1x16x128xf32> to vector<16x128xf32>
    %36 = vector.shape_cast %33 : vector<16x128xf32> to vector<1x16x128xf32>
    tpu.vector_store %arg6[%c0_10, %c0_11, %c0_12], %36 {strides = array<i32>} : memref<1x16x128xf32, #tpu.memory_space<vmem>>, vector<1x16x128xf32>,
    return
  }
  func.func @transform_0(%arg0: i32, %arg1: i32) -> (i32, i32, i32) {
    %c0_i32 = arith.constant 0 : i32
    %c0_i32_0 = arith.constant 0 : i32
    %c0_i32_1 = arith.constant 0 : i32
    return %arg0, %c0_i32, %c0_i32_0 : i32, i32, i32
  }
  func.func @transform_1(%arg0: i32, %arg1: i32) -> (i32, i32) {
    %c0_i32 = arith.constant 0 : i32
    %c0_i32_0 = arith.constant 0 : i32
    %c0_i32_1 = arith.constant 0 : i32
    return %c0_i32, %c0_i32_0 : i32, i32
  }
  func.func @transform_2(%arg0: i32, %arg1: i32) -> (i32, i32) {
    %c0_i32 = arith.constant 0 : i32
    %c0_i32_0 = arith.constant 0 : i32
    %c0_i32_1 = arith.constant 0 : i32
    return %c0_i32, %c0_i32_0 : i32, i32
  }
  func.func @transform_3(%arg0: i32, %arg1: i32) -> i32 {
    %c0_i32 = arith.constant 0 : i32
    %c0_i32_0 = arith.constant 0 : i32
    return %c0_i32 : i32
  }
  func.func @transform_4(%arg0: i32, %arg1: i32) -> (i32, i32, i32) {
    %c0_i32 = arith.constant 0 : i32
    %c0_i32_0 = arith.constant 0 : i32
    return %arg0, %c0_i32, %arg1 : i32, i32, i32
  }
}

</mosaic_0001>

<bundles_post_ra>
// kernel: tpu_custom_call.1
= control target key start
LH: loop header
LB: loop body
LE: loop exit
PB: predicated region body
PF: predicated region fallthrough
CT: control target
= control target key end

     0   :  { %s1519_s0 = inlined_call_operand.vmem [shape: f32[2,16,128], index: 0, kind: input, shape index: {}]   ;;  %s1520_s1 = inlined_call_operand.vmem [shape: bf16[48,16], index: 1, kind: input, shape index: {}]   ;;  %s1521_s2 = inlined_call_operand.vmem [shape: f32[48,1], index: 2, kind: input, shape index: {}]   ;;  %s1522_s3 = inlined_call_operand.<no memory space> [shape: f32[1], index: 3, kind: input, shape index: {}]   ;;  %s1523_s4 = inlined_call_operand.hbm [shape: f32[2,16,128], index: 4, kind: output, shape index: {}]  }
   0x1   :  { %9 = sst [smem:[#allocation3]] %s1522_s3 }
   0x2   :  { %10 = vsyncpa [#allocation5], 0 }
   0x3   :  { %12 = vsyncpa [#allocation5 + $0x1], 0  ;;  %s1232_s17 = smov 0   ;;  %s1234_s18 = smov 0  }
   0x4   :  { %s1236_s19 = smov 0   ;;  %s1238_s20 = smov 0  }
   0x5   :  { %s1240_s21 = smov 0   ;;  %s1242_s22 = smov 0  }
   0x6 LB: > { %s853_s3 = sadd.s32 4294967295, %s1196_s22   ;;  %s854_s23 = sadd.s32 4294967294, %s1196_s22   ;;  %s1196_s22 = sphi %s1242_s22, %s18_s22   ;;  %s1192_s21 = sphi %s1240_s21, %s1530_s21   ;;  %s1188_s20 = sphi %s1238_s20, %s1529_s20   ;;  %s1184_s19 = sphi %s1236_s19, %s1528_s19   ;;  %s1180_s18 = sphi %s1234_s18, %s1527_s18   ;;  %s1176_s17 = sphi %s1232_s17, %s1526_s17  }
   0x7   : > { %s30_s24 = sadd.s32 1, %s1192_s21  ;;  %s128_s25 = sadd.s32 1, %s1184_s19 }
   0x8   : > { %p32_p0 = scmp.ge.s32.totalorder %s30_s24, 2  ;;  %p138_p1 = scmp.ne.s32.totalorder %s1184_s19, %s1180_s18 }
   0x9   : > { %p139_p2 = scmp.eq.s32.totalorder %s853_s3, 1  ;;  %p144_p3 = scmp.ne.s32.totalorder %s1180_s18, %s1176_s17 }
   0xa   : > { %s1532_s24 = smov (%p32_p0, %s30_s24), 0  ;;  %p145_p5 = scmp.eq.s32.totalorder %s854_s23, 1 }
   0xb   : > { %p1272_p4 = por %p139_p2, %p138_p1  ;;  %s123_s27 = ssub.s32 %s1192_s21, %s1532_s24 }
   0xc   : > { %p857_p6 = scmp.ge.s32.totalorder %s1196_s22, 1  ;;  %p126_p7 = scmp.eq.s32.totalorder %s123_s27, 0 }
   0xd   : > { %p1279_p8 = por %p145_p5, %p144_p3  ;;  %p180_p9 = scmp.lt.s32.totalorder %s1196_s22, 3 }
   0xe   : > { %s1285_s29 = scalar_select %p126_p7, %s1184_s19, %s128_s25  }
   0xf   : > { %p181_p10 = pnand %p857_p6, %p180_p9 }
  0x10   : > { %p206_p11 = scmp.lt.s32.totalorder (!%p181_p10), %s1188_s20, 1  ;;  %s755_s10 = sld [smem:[#allocation3]] (!%p181_p10) }
  0x11   : > { %184 = sbr.rel (%p181_p10) target bundleno = 1157 (0x485), region = 36  ;;  %s203_s11 = sand.u32 (!%p181_p10), 1, %s1180_s18  }
  0x12   : > { %s858_s12 = sshll.u32 (!%p181_p10), %s203_s11, 4  ;;  %s896_s15 = sshll.u32 (!%p181_p10), %s1188_s20, 8 }
  0x13   : > { %s205_s13 = scalar_lea.vmem (!%p181_p10), [#allocation4], %s858_s12  ;;  %s1471_s23 = scalar_lea.hbm (!%p181_p10), %s1523_s4, %s896_s15 }
  0x14   : > { %s1474_s25 = scalar_lea.sflag (!%p181_p10), [#allocation5], %s203_s11  ;;  %s1201_s27 = smov (!%p181_p10), [#allocation4]  }
  0x15   : > { %s1124_s30 = sshll.u32 (!%p181_p10), %s1201_s27, 4  ;;  %s1125_s30 = int_to_ptr.vmem [resolvable:$false] %s1124_s30 }
  0x16   : > { %v1198_v0 = vmov 0.0   ;;  %vm1199_vm0 = vmmov 0   ;;  %v225_v1 = vld [vmem:[%s1521_s2] sm:$0xff]  ;;  %s207_s6 = scalar_select %p206_p11, %s1188_s20, 1  ;;  %v1200_v2 = vmov 0   ;;  %v227_v3 = vld [vmem:[%s1521_s2 + $0x10] sm:$0xff]  ;;  %v534_v53 = vlaneseq }
  0x17   : > { %936 = vmatprep.subr.bf16.mxu1 %v1198_v0  ;;  %938 = vmatprep.mubr.msk.bf16.mxu1 %vm1199_vm0, %v1198_v0  ;;  %v226_v4 = vld [vmem:[%s1521_s2 + $0x8] sm:$0xff]  ;;  %v228_v5 = vld [vmem:[%s1521_s2 + $0x18] sm:$0xff]  ;;  %v1050_v9 = vld [vmem:[%s1520_s1] sm:$0xff]   ;;  %vm276_vm1 = vcmask 130048   ;;  %s1126_s5 = scalar_lea.vmem %s1125_s30, 512 }
  0x18   : > { %1048 = vset.pattern.permute.xlu0 %v1200_v2  ;;  %1049 = vset.pattern.permute.xlu1 %v1200_v2  ;;  %s889_s9 = sshll.u32 %s207_s6, 4  ;;  %v1051_v10 = vld [vmem:[%s1520_s1 + $0x8] sm:$0xff]   ;;  %v1054_v11 = vld [vmem:[%s1520_s1 + $0x10] sm:$0xff]   ;;  %v535_v56 = vand.u32 127, %v534_v53 }
  0x19   : > { %233 = vperm.xlu0 %1048, %v225_v1   ;;  %968 = vmatprep.subr.bf16.mxu0 %v1198_v0  ;;  %s210_s14 = scalar_lea.vmem %s1519_s0, %s889_s9 }
  0x1a   : > { %243 = vperm.xlu1 %1049, %v227_v3   ;;  %984 = vmatprep.mubr.msk.bf16.mxu0 %vm1199_vm0, %v1198_v0  ;;  %v1310_v6 = vld [vmem:[%s210_s14] sm:$0xff]  ;;  %v1312_v7 = vld [vmem:[%s210_s14 + $0x8] sm:$0xff]  ;;  %vm536_vm2 = vcmp.lt.s32.totalorder %v535_v56, 64  ;;  %s778_s14 = sshll.u32 %s205_s13, 4  ;;  %s1466_s14 = int_to_ptr.vmem [resolvable:$true] %s778_s14 }
  0x1b   : > { %v218_v8 = vpack.c.bf16 %v1312_v7, %v1310_v6  ;;  %s1120_s20 = scalar_lea.vmem %s1466_s14, 256  ;;  %p1127_p1 = scmp.lt.s32.totalorder %s1466_s14, %s1125_s30 }
  0x1c   : > { %p1121_p12 = scmp.ne.s32.totalorder %s1466_s14, %s1120_s20  ;;  %p1128_p2 = scmp.lt.s32.totalorder %s1126_s5, %s1120_s20 }
  0x1d   : > { %238 = vperm.xlu0 %1048, %v226_v4   ;;  %937 = vmatpush3.bf16.msra.mxu1 %v218_v8 }
  0x1e   : > { %248 = vperm.xlu1 %1049, %v228_v5   ;;  %p1122_p13 = pnand %p1121_p12, %p1272_p4  ;;  %p1129_p3 = por %p1128_p2, %p1127_p1 }
  0x20   : > { %939 = vmatmul.mubr.msk.bf16.vlgmr.msra.gmra.mxu1 %vm276_vm1, %v1050_v9  ;;  %p1123_p0 = pneg %p1122_p13 }
  0x21   : > { %942 = vmatprep.mubr.msk.bf16.mxu1 %vm1199_vm0, %v1198_v0 }
  0x22   : > { %p1130_p5 = pnand %p1129_p3, %p1123_p0 }
  0x28   : > { %943 = vmatmul.mubr.msk.bf16.gmra.mxu1 %vm276_vm1, %v1051_v10 }
  0x29   : > { %946 = vmatprep.mubr.msk.bf16.mxu1 %vm1199_vm0, %v1198_v0 }
  0x30   : > { %947 = vmatmul.mubr.msk.bf16.gmra.mxu1 %vm276_vm1, %v1054_v11 }
  0x94   : > { %v234_v12 = vpop.permute.xlu0 %233 }
  0x95   : > { %v244_v15 = vpop.permute.xlu1 %243 }
  0x98   : > { %v239_v16 = vpop.permute.xlu0 %238 }
  0x99   : > { %v249_v24 = vpop.permute.xlu1 %248 }
  0xe0   : > { %v320_v13 = vpop.f32.mrf.mxu1 }
  0xe1   : > { %v321_v18 = vadd.f32 %v320_v13, %v234_v12 }
  0xe2   : > { %v940_v14 = vpop.f32.mrf.mxu1 }
  0xe4   : > { %v323_v17 = vpop.f32.mrf.mxu1 }
  0xe5   : > { %v324_v19 = vadd.f32 %v323_v17, %v239_v16 }
  0xe6   : > { %v941_v20 = vpop.f32.mrf.mxu1 }
  0xe7   : > { %v900_v21 = vpack.c.bf16 %v324_v19, %v321_v18 }
  0xe8   : > { %v328_v22 = vpop.f32.mrf.mxu1 }
  0xe9   : > { %901 = vst [vmem:[#allocation2] sm:$0xff] %v900_v21   ;;  %v329_v25 = vadd.f32 %v328_v22, %v244_v15 }
  0xea   : > { %v944_v23 = vpop.f32.mrf.mxu1 }
  0xec   : > { %v331_v26 = vpop.f32.mrf.mxu1 }
  0xed   : > { %v332_v27 = vadd.f32 %v331_v26, %v249_v24 }
  0xee   : > { %v945_v28 = vpop.f32.mrf.mxu1 }
  0xef   : > { %v905_v29 = vpack.c.bf16 %v332_v27, %v329_v25 }
  0xf0   : > { %v1052_v30 = vld [vmem:[#allocation2] sm:$0xff]   ;;  %v1332_v32 = vpop.f32.mrf.mxu1 }
  0xf1   : > { %912 = vst [vmem:[#allocation2 + $0x8] sm:$0xff] %v905_v29   ;;  %390 = vxpose.xlu0.c.b16.start.end [1/1] (short) %v1052_v30, 128 }
  0xf2   : > { %v948_v33 = vpop.f32.mrf.mxu1 }
  0xf4   : > { %v1334_v34 = vpop.f32.mrf.mxu1 }
  0xf6   : > { %v949_v35 = vpop.f32.mrf.mxu1 }
  0xf8   : > { %v1053_v31 = vld [vmem:[#allocation2 + $0x8] sm:$0xff]  }
  0xf9   : > { %950 = vmatprep.subr.bf16.mxu1 %v1053_v31 }
  0xfa   : > { %951 = vmatpush3.bf16.msra.mxu1 %v1053_v31 }
 0x153   : > { %v398_v36 = vpop.trf.xlu0 }
 0x154   : > { %952 = vmatprep.mubr.msk.bf16.mxu1 %vm276_vm1, %v398_v36 }
 0x157   : > { %v399_v37 = vpop.trf.xlu0 }
 0x158   : > { %953 = vmatmul.mubr.msk.bf16.vlgmr.msra.gmra.mxu1 %vm276_vm1, %v399_v37 }
 0x15b   : > { %v400_v38 = vpop.trf.xlu0 }
 0x15c   : > { %956 = vmatprep.mubr.msk.bf16.mxu1 %vm276_vm1, %v400_v38 }
 0x15f   : > { %v401_v39 = vpop.trf.xlu0 }
 0x160   : > { %957 = vmatmul.mubr.msk.bf16.gmra.mxu1 %vm276_vm1, %v401_v39 }
 0x163   : > { %v402_v40 = vpop.trf.xlu0 }
 0x164   : > { %960 = vmatprep.mubr.msk.bf16.mxu1 %vm276_vm1, %v402_v40 }
 0x167   : > { %v403_v41 = vpop.trf.xlu0 }
 0x168   : > { %961 = vmatmul.mubr.msk.bf16.gmra.mxu1 %vm276_vm1, %v403_v41 }
 0x16b   : > { %v404_v42 = vpop.trf.xlu0 }
 0x16c   : > { %964 = vmatprep.mubr.msk.bf16.mxu1 %vm276_vm1, %v404_v42 }
 0x16f   : > { %v405_v43 = vpop.trf.xlu0 }
 0x170   : > { %965 = vmatmul.mubr.msk.bf16.gmra.mxu1 %vm276_vm1, %v405_v43 }
 0x218   : > { %v954_v44 = vpop.f32.mrf.mxu1 }
 0x219   : > { %v1371_v15 = vsel %vm536_vm2, %v954_v44, -1e+30 }
 0x21a   : > { %v471_v45 = vpop.f32.mrf.mxu1 }
 0x21b   : > { %v1375_v16 = vsel %vm536_vm2, %v471_v45, -1e+30 }
 0x21c   : > { %v955_v46 = vpop.f32.mrf.mxu1 }
 0x21d   : > { %v1353_v4 = vsel %vm536_vm2, %v955_v46, -1e+30 }
 0x21e   : > { %v474_v47 = vpop.f32.mrf.mxu1 }
 0x21f   : > { %v1358_v8 = vsel %vm536_vm2, %v474_v47, -1e+30 }
 0x220   : > { %v958_v48 = vpop.f32.mrf.mxu1 }
 0x221   : > { %v543_v12 = vsel %vm536_vm2, %v958_v48, -1e+30 }
 0x222   : > { %v487_v49 = vpop.f32.mrf.mxu1 }
 0x223   : > { %v1367_v14 = vsel %vm536_vm2, %v487_v49, -1e+30 }
 0x224   : > { %v959_v50 = vpop.f32.mrf.mxu1 }
 0x225   : > { %v544_v13 = vsel %vm536_vm2, %v959_v50, -1e+30 }
 0x226   : > { %v490_v51 = vpop.f32.mrf.mxu1 }
 0x227   : > { %v1348_v2 = vsel %vm536_vm2, %v490_v51, -1e+30 }
 0x228   : > { %v962_v52 = vpop.f32.mrf.mxu1 }
 0x229   : > { %v547_v5 = vsel %vm536_vm2, %v962_v52, -1e+30 }
 0x22a   : > { %v503_v54 = vpop.f32.mrf.mxu1 }
 0x22b   : > { %v545_v10 = vsel %vm536_vm2, %v503_v54, -1e+30 }
 0x22c   : > { %v963_v55 = vpop.f32.mrf.mxu1 }
 0x22d   : > { %v548_v9 = vsel %vm536_vm2, %v963_v55, -1e+30 }
 0x22e   : > { %v506_v57 = vpop.f32.mrf.mxu1 }
 0x22f   : > { %v546_v11 = vsel %vm536_vm2, %v506_v57, -1e+30 }
 0x230   : > { %v966_v58 = vpop.f32.mrf.mxu1 }
 0x231   : > { %v551_v59 = vsel %vm536_vm2, %v966_v58, -1e+30 }
 0x232   : > { %581 = vmax.xlane.f32.xlu1 %v551_v59  ;;  %v519_v60 = vpop.f32.mrf.mxu1 }
 0x233   : > { %v549_v62 = vsel %vm536_vm2, %v519_v60, -1e+30 }
 0x234   : > { %v967_v61 = vpop.f32.mrf.mxu1 }
 0x235   : > { %v552_v63 = vsel %vm536_vm2, %v967_v61, -1e+30 }
 0x236   : > { %577 = vmax.xlane.f32.xlu1 %v549_v62  ;;  %583 = vmax.xlane.f32.xlu0 %v552_v63  ;;  %v522_v1 = vpop.f32.mrf.mxu1 }
 0x237   : > { %v550_v3 = vsel %vm536_vm2, %v522_v1, -1e+30 }
 0x23a   : > { %563 = vmax.xlane.f32.xlu0 %v1348_v2  ;;  %579 = vmax.xlane.f32.xlu1 %v550_v3 }
 0x23e   : > { %559 = vmax.xlane.f32.xlu0 %v1353_v4  ;;  %573 = vmax.xlane.f32.xlu1 %v547_v5 }
 0x242   : > { %555 = vmax.xlane.f32.xlu0 %v1358_v8  ;;  %575 = vmax.xlane.f32.xlu1 %v548_v9 }
 0x246   : > { %569 = vmax.xlane.f32.xlu1 %v545_v10 }
 0x24a   : > { %571 = vmax.xlane.f32.xlu1 %v546_v11 }
 0x24e   : > { %565 = vmax.xlane.f32.xlu1 %v543_v12 }
 0x252   : > { %567 = vmax.xlane.f32.xlu1 %v544_v13 }
 0x256   : > { %561 = vmax.xlane.f32.xlu1 %v1367_v14 }
 0x25a   : > { %557 = vmax.xlane.f32.xlu1 %v1371_v15 }
 0x25e   : > { %553 = vmax.xlane.f32.xlu1 %v1375_v16 }
 0x2bb   : > { %v582_v17 = vpop.xlane.xlu1 %581 }
 0x2bc   : > { %v599_v18 = vsub.f32 %v551_v59, %v582_v17 }
 0x2be   : > { %v629_v19 = vmul.f32 1.442695, %v599_v18 }
 0x2bf   : > { %v578_v20 = vpop.xlane.xlu1 %577  ;;  %v584_v21 = vpop.xlane.xlu0 %583 }
 0x2c0   : > { %1056 = vpow2.f32 %v629_v19  ;;  %v597_v22 = vsub.f32 %v549_v62, %v578_v20  ;;  %v600_v23 = vsub.f32 %v552_v63, %v584_v21 }
 0x2c2   : > { %v625_v24 = vmul.f32 1.442695, %v597_v22  ;;  %v631_v25 = vmul.f32 1.442695, %v600_v23  ;;  %v229_v22 = vld [vmem:[%s1521_s2 + $0x20] sm:$0xff]  ;;  %v230_v23 = vld [vmem:[%s1521_s2 + $0x28] sm:$0xff] }
 0x2c3   : > { %v580_v26 = vpop.xlane.xlu1 %579  ;;  %v564_v44 = vpop.xlane.xlu0 %563 }
 0x2c4   : > { %1058 = vpow2.f32 %v625_v24  ;;  %v598_v27 = vsub.f32 %v550_v3, %v580_v26  ;;  %v590_v53 = vsub.f32 %v1348_v2, %v564_v44 }
 0x2c5   : > { %1060 = vpow2.f32 %v631_v25 }
 0x2c6   : > { %v627_v28 = vmul.f32 1.442695, %v598_v27  ;;  %v611_v58 = vmul.f32 1.442695, %v590_v53 }
 0x2c7   : > { %v574_v29 = vpop.xlane.xlu1 %573  ;;  %v560_v51 = vpop.xlane.xlu0 %559 }
 0x2c8   : > { %v595_v30 = vsub.f32 %v547_v5, %v574_v29  ;;  %1062 = vpow2.f32 %v627_v28  ;;  %v588_v59 = vsub.f32 %v1353_v4, %v560_v51 }
 0x2ca   : > { %v621_v31 = vmul.f32 1.442695, %v595_v30  ;;  %v607_v2 = vmul.f32 1.442695, %v588_v59 }
 0x2cb   : > { %v576_v33 = vpop.xlane.xlu1 %575  ;;  %v556_v61 = vpop.xlane.xlu0 %555 }
 0x2cc   : > { %v596_v35 = vsub.f32 %v548_v9, %v576_v33  ;;  %1064 = vpow2.f32 %v621_v31  ;;  %v586_v3 = vsub.f32 %v1358_v8, %v556_v61 }
 0x2cd   : > { %v1378_v36 = vpop.eup %1056 }
 0x2ce   : > { %v623_v37 = vmul.f32 1.442695, %v596_v35  ;;  %661 = vadd.xlane.f32.xlu1 %v1378_v36 }
 0x2cf   : > { %v570_v38 = vpop.xlane.xlu1 %569 }
 0x2d0   : > { %v593_v39 = vsub.f32 %v545_v10, %v570_v38  ;;  %1066 = vpow2.f32 %v623_v37 }
 0x2d1   : > { %v1381_v40 = vpop.eup %1058 }
 0x2d2   : > { %v1383_v41 = vpop.eup %1060  ;;  %v617_v42 = vmul.f32 1.442695, %v593_v39  ;;  %657 = vadd.xlane.f32.xlu1 %v1381_v40 }
 0x2d3   : > { %663 = vadd.xlane.f32.xlu0 %v1383_v41  ;;  %v572_v43 = vpop.xlane.xlu1 %571 }
 0x2d4   : > { %1068 = vpow2.f32 %v617_v42  ;;  %v594_v45 = vsub.f32 %v546_v11, %v572_v43  ;;  %v603_v11 = vmul.f32 1.442695, %v586_v3 }
 0x2d5   : > { %v1387_v46 = vpop.eup %1062 }
 0x2d6   : > { %v619_v47 = vmul.f32 1.442695, %v594_v45 }
 0x2d7   : > { %659 = vadd.xlane.f32.xlu0 %v1387_v46  ;;  %v566_v48 = vpop.xlane.xlu1 %565 }
 0x2d8   : > { %1070 = vpow2.f32 %v619_v47  ;;  %v591_v49 = vsub.f32 %v543_v12, %v566_v48 }
 0x2d9   : > { %v1390_v50 = vpop.eup %1064 }
 0x2da   : > { %v613_v52 = vmul.f32 1.442695, %v591_v49  ;;  %653 = vadd.xlane.f32.xlu1 %v1390_v50 }
 0x2db   : > { %v568_v54 = vpop.xlane.xlu1 %567 }
 0x2dc   : > { %1072 = vpow2.f32 %v613_v52  ;;  %v592_v55 = vsub.f32 %v544_v13, %v568_v54 }
 0x2dd   : > { %v1394_v56 = vpop.eup %1066 }
 0x2de   : > { %v615_v57 = vmul.f32 1.442695, %v592_v55  ;;  %655 = vadd.xlane.f32.xlu0 %v1394_v56 }
 0x2df   : > { %v562_v60 = vpop.xlane.xlu1 %561 }
 0x2e0   : > { %1074 = vpow2.f32 %v615_v57  ;;  %v589_v62 = vsub.f32 %v1367_v14, %v562_v60 }
 0x2e1   : > { %v1399_v63 = vpop.eup %1068  ;;  %1076 = vpow2.f32 %v611_v58 }
 0x2e2   : > { %v609_v1 = vmul.f32 1.442695, %v589_v62  ;;  %649 = vadd.xlane.f32.xlu1 %v1399_v63 }
 0x2e3   : > { %v558_v5 = vpop.xlane.xlu1 %557 }
 0x2e4   : > { %1078 = vpow2.f32 %v609_v1  ;;  %v587_v4 = vsub.f32 %v1371_v15, %v558_v5 }
 0x2e5   : > { %v1404_v9 = vpop.eup %1070  ;;  %1080 = vpow2.f32 %v607_v2 }
 0x2e6   : > { %v605_v10 = vmul.f32 1.442695, %v587_v4  ;;  %651 = vadd.xlane.f32.xlu0 %v1404_v9 }
 0x2e7   : > { %v554_v12 = vpop.xlane.xlu1 %553 }
 0x2e8   : > { %1082 = vpow2.f32 %v605_v10  ;;  %v585_v13 = vsub.f32 %v1375_v16, %v554_v12 }
 0x2e9   : > { %v1408_v14 = vpop.eup %1072  ;;  %1084 = vpow2.f32 %v603_v11 }
 0x2ea   : > { %v601_v17 = vmul.f32 1.442695, %v585_v13  ;;  %645 = vadd.xlane.f32.xlu1 %v1408_v14 }
 0x2ec   : > { %1086 = vpow2.f32 %v601_v17 }
 0x2ed   : > { %v1411_v8 = vpop.eup %1074 }
 0x2ee   : > { %647 = vadd.xlane.f32.xlu0 %v1411_v8  ;;  %v1414_v15 = vpop.eup %1076 }
 0x2f1   : > { %v1416_v18 = vpop.eup %1078 }
 0x2f2   : > { %643 = vadd.xlane.f32.xlu0 %v1414_v15  ;;  %641 = vadd.xlane.f32.xlu1 %v1416_v18  ;;  %v1420_v16 = vpop.eup %1080 }
 0x2f5   : > { %v1422_v19 = vpop.eup %1082 }
 0x2f6   : > { %639 = vadd.xlane.f32.xlu0 %v1420_v16  ;;  %637 = vadd.xlane.f32.xlu1 %v1422_v19  ;;  %v1426_v20 = vpop.eup %1084 }
 0x2f9   : > { %v1428_v21 = vpop.eup %1086 }
 0x2fa   : > { %635 = vadd.xlane.f32.xlu0 %v1426_v20  ;;  %633 = vadd.xlane.f32.xlu1 %v1428_v21 }
 0x30b   : > { %253 = vperm.xlu1 %1049, %v229_v22  }
 0x310   : > { %258 = vperm.xlu0 %1048, %v230_v23  }
 0x357   : > { %v662_v24 = vpop.xlane.xlu1 %661 }
 0x358   : > { %1088 = vrcp.f32 %v662_v24 }
 0x35b   : > { %v658_v26 = vpop.xlane.xlu1 %657 }
 0x35c   : > { %v664_v25 = vpop.xlane.xlu0 %663 }
 0x35d   : > { %1090 = vrcp.f32 %v664_v25 }
 0x360   : > { %v660_v27 = vpop.xlane.xlu0 %659 }
 0x361   : > { %1092 = vrcp.f32 %v660_v27 }
 0x362   : > { %1094 = vrcp.f32 %v658_v26 }
 0x363   : > { %v654_v29 = vpop.xlane.xlu1 %653 }
 0x365   : > { %v1089_v28 = vpop.eup %1088 }
 0x366   : > { %v695_v33 = vmul.f32 %v1089_v28, %v1378_v36 }
 0x367   : > { %v656_v30 = vpop.xlane.xlu0 %655 }
 0x368   : > { %1096 = vrcp.f32 %v656_v30 }
 0x369   : > { %1098 = vrcp.f32 %v654_v29 }
 0x36a   : > { %v1091_v31 = vpop.eup %1090 }
 0x36b   : > { %v696_v35 = vmul.f32 %v1091_v31, %v1383_v41  ;;  %v650_v43 = vpop.xlane.xlu1 %649 }
 0x36d   : > { %v704_v37 = vpack.c.bf16 %v696_v35, %v695_v33 }
 0x36e   : > { %v1093_v38 = vpop.eup %1092 }
 0x36f   : > { %969 = vmatpush3.bf16.xpose.msra.mxu0 %v704_v37  ;;  %v652_v39 = vpop.xlane.xlu0 %651  ;;  %v1095_v42 = vpop.eup %1094  ;;  %v694_v44 = vmul.f32 %v1093_v38, %v1387_v46 }
 0x370   : > { %970 = vmatprep.subr.bf16.mxu0 %v1198_v0  ;;  %1100 = vrcp.f32 %v652_v39  ;;  %v693_v45 = vmul.f32 %v1095_v42, %v1381_v40 }
 0x371   : > { %1102 = vrcp.f32 %v650_v43 }
 0x372   : > { %v703_v47 = vpack.c.bf16 %v694_v44, %v693_v45 }
 0x373   : > { %v646_v49 = vpop.xlane.xlu1 %645 }
 0x375   : > { %v1097_v48 = vpop.eup %1096 }
 0x376   : > { %v1099_v41 = vpop.eup %1098  ;;  %v692_v51 = vmul.f32 %v1097_v48, %v1394_v56 }
 0x377   : > { %971 = vmatpush3.bf16.xpose.msra.mxu0 %v703_v47  ;;  %v648_v36 = vpop.xlane.xlu0 %647  ;;  %v691_v54 = vmul.f32 %v1099_v41, %v1390_v50 }
 0x378   : > { %972 = vmatprep.subr.bf16.mxu0 %v1198_v0  ;;  %1104 = vrcp.f32 %v648_v36 }
 0x379   : > { %1106 = vrcp.f32 %v646_v49  ;;  %v702_v46 = vpack.c.bf16 %v692_v51, %v691_v54 }
 0x37b   : > { %v644_v52 = vpop.xlane.xlu0 %643  ;;  %v642_v53 = vpop.xlane.xlu1 %641 }
 0x37c   : > { %1108 = vrcp.f32 %v644_v52 }
 0x37d   : > { %v1101_v55 = vpop.eup %1100  ;;  %1110 = vrcp.f32 %v642_v53 }
 0x37e   : > { %v1103_v57 = vpop.eup %1102  ;;  %v690_v59 = vmul.f32 %v1101_v55, %v1404_v9 }
 0x37f   : > { %973 = vmatpush3.bf16.xpose.msra.mxu0 %v702_v46  ;;  %v638_v40 = vpop.xlane.xlu1 %637  ;;  %v640_v58 = vpop.xlane.xlu0 %639  ;;  %v689_v56 = vmul.f32 %v1103_v57, %v1399_v63 }
 0x380   : > { %974 = vmatprep.subr.bf16.mxu0 %v1198_v0  ;;  %1112 = vrcp.f32 %v640_v58 }
 0x381   : > { %v701_v61 = vpack.c.bf16 %v690_v59, %v689_v56  ;;  %1114 = vrcp.f32 %v638_v40 }
 0x383   : > { %v634_v60 = vpop.xlane.xlu1 %633  ;;  %v636_v1 = vpop.xlane.xlu0 %635 }
 0x384   : > { %1116 = vrcp.f32 %v636_v1 }
 0x385   : > { %v1105_v62 = vpop.eup %1104  ;;  %1118 = vrcp.f32 %v634_v60 }
 0x386   : > { %v1107_v50 = vpop.eup %1106  ;;  %v688_v3 = vmul.f32 %v1105_v62, %v1411_v8 }
 0x387   : > { %975 = vmatpush3.bf16.xpose.msra.mxu0 %v701_v61  ;;  %v254_v2 = vpop.permute.xlu1 %253  ;;  %v687_v4 = vmul.f32 %v1107_v50, %v1408_v14 }
 0x388   : > { %976 = vmatprep.subr.bf16.mxu0 %v1198_v0  ;;  %v337_v9 = vadd.f32 %v1332_v32, %v254_v2 }
 0x389   : > { %v1109_v63 = vpop.eup %1108  ;;  %v700_v11 = vpack.c.bf16 %v688_v3, %v687_v4 }
 0x38a   : > { %v1111_v12 = vpop.eup %1110  ;;  %v686_v8 = vmul.f32 %v1109_v63, %v1414_v15 }
 0x38b   : > { %v259_v5 = vpop.permute.xlu0 %258  ;;  %v685_v17 = vmul.f32 %v1111_v12, %v1416_v18 }
 0x38c   : > { %v340_v10 = vadd.f32 %v1334_v34, %v259_v5 }
 0x38d   : > { %v1113_v22 = vpop.eup %1112  ;;  %v699_v14 = vpack.c.bf16 %v686_v8, %v685_v17 }
 0x38e   : > { %v910_v13 = vpack.c.bf16 %v340_v10, %v337_v9  ;;  %v1115_v23 = vpop.eup %1114  ;;  %v684_v34 = vmul.f32 %v1113_v22, %v1420_v16 }
 0x38f   : > { %977 = vmatpush3.bf16.xpose.msra.mxu0 %v700_v11  ;;  %v683_v32 = vmul.f32 %v1115_v23, %v1422_v19  ;;  %v756_v19 = vstv %s755_s10 }
 0x390   : > { %913 = vst [vmem:[#allocation2 + $0x10] sm:$0xff] %v910_v13   ;;  %978 = vmatprep.subr.bf16.mxu0 %v1198_v0 }
 0x391   : > { %v1117_v24 = vpop.eup %1116  ;;  %v698_v25 = vpack.c.bf16 %v684_v34, %v683_v32 }
 0x392   : > { %v1119_v26 = vpop.eup %1118  ;;  %v682_v15 = vmul.f32 %v1117_v24, %v1426_v20 }
 0x393   : > { %v681_v18 = vmul.f32 %v1119_v26, %v1428_v21 }
 0x395   : > { %v697_v27 = vpack.c.bf16 %v682_v15, %v681_v18 }
 0x397   : > { %979 = vmatpush3.bf16.xpose.msra.mxu0 %v699_v14  ;;  %v1055_v28 = vld [vmem:[#allocation2 + $0x10] sm:$0xff]  }
 0x398   : > { %980 = vmatprep.subr.bf16.mxu0 %v1198_v0 }
 0x39f   : > { %981 = vmatpush3.bf16.xpose.msra.mxu0 %v698_v25 }
 0x3a0   : > { %982 = vmatprep.subr.bf16.mxu0 %v1198_v0 }
 0x3a7   : > { %983 = vmatpush3.bf16.xpose.msra.mxu0 %v697_v27 }
 0x3ae   : > { %985 = vmatmul.mubr.bf16.vlgmr.msra.gmra.mxu0 %v1055_v28 }
 0x46e   : > { %v745_v16 = vpop.f32.mrf.mxu0 }
 0x46f   : > { %v757_v29 = vmul.f32 %v756_v19, %v745_v16 }
 0x470   : > { %v986_v30 = vpop.f32.mrf.mxu0 }
 0x471   : > { %v759_v31 = vadd.f32 %v757_v29, %v1310_v6 }
 0x472   : > { %v748_v0 = vpop.f32.mrf.mxu0 }
 0x473   : > { %761 = vst [vmem:[%s205_s13] sm:$0xff] %v759_v31  ;;  %v758_v20 = vmul.f32 %v756_v19, %v748_v0 }
 0x474   : > { %v987_v21 = vpop.f32.mrf.mxu0 }
 0x475   : > { %v760_v33 = vadd.f32 %v758_v20, %v1312_v7 }
 0x477   : > { %762 = vst [vmem:[%s205_s13 + $0x8] sm:$0xff] %v760_v33 }
 0x478   : > { %1133 = shalt.err (!%p1130_p5)
}
 0x479   : > { %s1134_s6 = scalar_lea.hbm %s1471_s23, 256  ;;  %s1138_s9 = scalar_lea.hbm %s1523_s4, 512 }
 0x47a   : > { %p1135_p6 = scmp.ne.s32.totalorder %s1471_s23, %s1134_s6  ;;  %p1139_p10 = scmp.lt.s32.totalorder %s1471_s23, %s1523_s4 }
 0x47b   : > { %p1140_p11 = scmp.lt.s32.totalorder %s1138_s9, %s1134_s6 }
 0x47c   : > { %p1136_p7 = pnand %p1135_p6, %p1272_p4 }
 0x47d   : > { %p1141_p12 = por %p1140_p11, %p1139_p10 }
 0x47e   : > { %p1137_p9 = pneg %p1136_p7 }
 0x480   : > { %p1142_p13 = pnand %p1141_p12, %p1137_p9 }
 0x482   : > { %1145 = shalt.err (!%p1142_p13)
}
 0x483   : > { %s1202_s12 = smov 128   ;;  %s1203_s13 = smov 8  }
 0x484   : > { %988 = dma.vmem_to_hbm [thread:$0]  (%p1272_p4), %s1466_s14, 256, %s1471_s23, %s1474_s25, %s1202_s12, %s1202_s12, %s1203_s13  }
 0x485 PF: > { %p994_p0 = scmp.ge.s32.totalorder %s1196_s22, 2  ;;  %s793_s15 = sand.u32 1, %s1176_s17  }
 0x486   : > { %s794_s16 = scalar_lea.sflag [#allocation5], %s793_s15 }
 0x487   : > { %p991_p1 = pnand %p994_p0, %p1279_p8 }
 0x489   : > { %p992_p2 = pneg %p991_p1 }
 0x48b   : > { %1171 = dma.done.wait (%p992_p2), %s794_s16, 256  }
 0x48c   : > { %1173 = vsyncadd (%p992_p2), %s794_s16, 4294967040  ;;  %s18_s22 = sadd.s32 1, %s1196_s22   ;;  %s1526_s17 = smov %s1180_s18 }
 0x48d   : > { %p15_p3 = scmp.ge.s32.totalorder %s18_s22, 4   ;;  %s1527_s18 = smov %s1184_s19 }
 0x48e   : > { %s1528_s19 = smov %s1285_s29  ;;  %s1529_s20 = smov %s1192_s21 }
 0x48f   : > { %s1530_s21 = smov %s1532_s24  ;;  %17 = sbr.rel (!%p15_p3) target bundleno = 6 (0x6), region = 77 }
 0x494   :  { %799 = vsyncpa [#allocation5], 1 }
 0x495   :  { %801 = vsyncpa [#allocation5 + $0x1], 1 }

</bundles_post_ra>
